<compile_context>
chip_gen: v5e
topology: v5e:2x2
jax: 0.10.0
libtpu: 0.0.40
codegen_flags: <defaults>
</compile_context>

<pallas_src>
import jax
import jax.numpy as jnp
from jax.experimental import pallas as pl
from jax.experimental.pallas import tpu as pltpu

EPS = 1e-5
NEG_SLOPE = 0.01
LANE = 128


def _round_up(x, m):
    return ((x + m - 1) // m) * m


def _cdiv(a, b):
    return (a + b - 1) // b


# --------------------------------------------------------------------------- #
# Kernel:
#   y = lrelu(x @ W0 + b0); y = lrelu(y @ W1 + b1); y = lrelu(y @ W2 + b2)
#   out = (y @ W3 + b3) * x            (W3 columns pre-shifted onto pack lanes)
# bf16 matmul operands, f32 accumulation / bias / activation / mask.
# --------------------------------------------------------------------------- #
def draftnet_kernel(x_ref, w_ref, b_ref, out_ref):
    x = x_ref[...]                                   # (tb, n_pad) f32: [col|pack|0]
    y = x.astype(jnp.bfloat16)
    for layer in range(3):                           # unrolled at trace time
        z = jnp.dot(y, w_ref[layer], preferred_element_type=jnp.float32)
        z = z + b_ref[layer]                         # (1, n_pad) f32 broadcast
        y = jnp.maximum(z, NEG_SLOPE * z).astype(jnp.bfloat16)
    z = jnp.dot(y, w_ref[3], preferred_element_type=jnp.float32) + b_ref[3]
    # Layer-4 output occupies lanes [ss, 2ss) where the input slab holds `pack`,
    # so the elementwise mask is a plain multiply with the (f32) input slab.
    out_ref[...] = z * x


# --------------------------------------------------------------------------- #
# Host-side algebra: fold BN + set-feature matmul + concat into 4 weight slabs.
# --------------------------------------------------------------------------- #
def fold_and_pad_params(p):
    setT = p["setT"]                       # (ss, M) = set_tensor^T
    ss, M = setT.shape

    def bn_scale_shift(g, b, m, v):
        s = g / jnp.sqrt(v + EPS)          # (1, n)
        t = b - m * s
        return s[0], t[0]                  # (n,)

    s0, t0 = bn_scale_shift(p["g0"], p["b0"], p["m0"], p["v0"])
    s1, t1 = bn_scale_shift(p["g1"], p["bt1"], p["m1"], p["v1"])
    s2, t2 = bn_scale_shift(p["g2"], p["bt2"], p["m2"], p["v2"])
    s3, t3 = bn_scale_shift(p["g3"], p["bt3"], p["m3"], p["v3"])

    # layer 1: bn0 -> linear1 -> bn1, all folded onto `collection` directly:
    #   bn0(cf) @ W1 + b1 = cf @ (s0[:,None]*W1) + (t0 @ W1 + b1)
    #   cf @ Ws = collection @ (Ws[:ss] + setT @ Ws[ss:])   since cf = [col, col@setT]
    W1, b1 = p["w1"], p["bb1"][0]
    W1s = s0[:, None] * W1                                   # (ss+M, ss)
    W1e = W1s[:ss] + setT @ W1s[ss:]                         # (ss, ss)
    b1e = t0 @ W1 + b1                                       # (ss,)
    W1f, B1f = W1e * s1[None, :], b1e * s1 + t1

    # layers 2,3: fold the trailing BN into the Linear (column scale + shift)
    W2f, B2f = p["w2"] * s2[None, :], p["bb2"][0] * s2 + t2
    W3f, B3f = p["w3"] * s3[None, :], p["bb3"][0] * s3 + t3
    W4f, B4f = p["w4"], p["bb4"][0]

    # Slab width must hold [collection | pack] = 2*ss lanes; keep it 128-lane
    # dense, and bump to a 256 multiple when wider than one vreg row (v6e/v7x
    # MXUs are 256-wide).
    n_pad = _round_up(2 * ss, LANE)
    if n_pad > LANE:
        n_pad = _round_up(n_pad, 2 * LANE)

    def pad_w(w, col_off=0):
        return jnp.zeros((n_pad, n_pad), jnp.float32).at[:ss, col_off:col_off + ss].set(w)

    def pad_b(b, col_off=0):
        return jnp.zeros((1, n_pad), jnp.float32).at[0, col_off:col_off + ss].set(b)

    # Layer 4's columns are shifted to lanes [ss, 2ss) so its output aligns with
    # the pack lanes of the input slab (mask == elementwise multiply in-kernel).
    W = jnp.stack([pad_w(W1f), pad_w(W2f), pad_w(W3f), pad_w(W4f, ss)])
    W = W.astype(jnp.bfloat16)                                    # bf16 MXU operands
    Bias = jnp.stack([pad_b(B1f), pad_b(B2f), pad_b(B3f), pad_b(B4f, ss)])  # f32
    return {"W": W, "B": Bias, "ss": ss, "n_pad": n_pad}


# --------------------------------------------------------------------------- #
# Batch-tile heuristic: minimize padding, amortize per-step overhead, and keep
# >= 2 (even) grid steps when the batch allows so both v7x TCs are fed.
# --------------------------------------------------------------------------- #
def _choose_tb(bsz, cap=1024):
    n_tiles = _cdiv(bsz, cap)
    if bsz >= 16:                       # room for two >=8-row tiles
        n_tiles = max(n_tiles, 2)
        if n_tiles % 2:
            n_tiles += 1
    return max(8, _round_up(_cdiv(bsz, n_tiles), 8))


# --------------------------------------------------------------------------- #
# Wrapper: batch-tiled, weights-resident, lane-dense pallas_call.
# --------------------------------------------------------------------------- #
def draftnet_forward(x, folded):
    ss, n_pad = folded["ss"], folded["n_pad"]
    W, Bias = folded["W"], folded["B"]
    bsz = x.shape[0]

    tb = _choose_tb(bsz)
    grid = _cdiv(bsz, tb)
    b_pad = grid * tb

    # One merged input slab: collection in lanes [0, ss), pack in lanes [ss, 2ss).
    # Kept in f32 so the pack mask (and collection) stay exact; matmul operands are
    # cast to bf16 inside the kernel.
    # NOTE: for very large batches this host-side pad could be replaced by a
    # memory_space=pl.ANY input + manual DMA of (tb, 2*ss) slabs to avoid the
    # padded HBM copy entirely.
    slab = jnp.zeros((b_pad, n_pad), jnp.float32).at[:bsz, :2 * ss].set(
        x.astype(jnp.float32))

    out = pl.pallas_call(
        draftnet_kernel,
        out_shape=jax.ShapeDtypeStruct((b_pad, n_pad), jnp.float32),
        grid_spec=pltpu.PrefetchScalarGridSpec(
            num_scalar_prefetch=0,
            grid=(grid,),
            in_specs=[
                pl.BlockSpec((tb, n_pad), lambda i: (i, 0)),            # input slab tile
                pl.BlockSpec((4, n_pad, n_pad), lambda i: (0, 0, 0)),   # weights (resident)
                pl.BlockSpec((4, 1, n_pad), lambda i: (0, 0, 0)),       # biases  (resident)
            ],
            out_specs=pl.BlockSpec((tb, n_pad), lambda i: (i, 0)),
        ),
        compiler_params=pltpu.CompilerParams(
            dimension_semantics=("parallel",),   # batch axis shards across v7x TCs
        ),
    )(slab, W, Bias)

    # Layer-4 output (already pack-masked) lives in lanes [ss, 2ss).
    return out[:bsz, ss:2 * ss]


# --------------------------------------------------------------------------- #
# Synthetic parameters (PyTorch Linear weights pre-transposed to (in, out)).
# --------------------------------------------------------------------------- #
def make_params(key, ss, M):
    ks = jax.random.split(key, 32)
    i = iter(range(32))

    def nrm(shape, scale=0.1):
        return (scale * jax.random.normal(ks[next(i)], shape)).astype(jnp.float32)

    def bn_params(n):
        g = 1.0 + nrm((1, n))
        b = nrm((1, n))
        m = nrm((1, n))
        v = jnp.abs(nrm((1, n))) + 1.0     # running_var > 0
        return g, b, m, v

    set_tensor = nrm((M, ss), scale=1.0)   # M x ss, as in the module
    p = {"setT": jnp.transpose(set_tensor)}  # (ss, M)

    size_in = ss + M
    p["g0"], p["b0"], p["m0"], p["v0"] = bn_params(size_in)
    p["w1"], p["bb1"] = nrm((size_in, ss)), nrm((1, ss))
    p["g1"], p["bt1"], p["m1"], p["v1"] = bn_params(ss)
    p["w2"], p["bb2"] = nrm((ss, ss)), nrm((1, ss))
    p["g2"], p["bt2"], p["m2"], p["v2"] = bn_params(ss)
    p["w3"], p["bb3"] = nrm((ss, ss)), nrm((1, ss))
    p["g3"], p["bt3"], p["m3"], p["v3"] = bn_params(ss)
    p["w4"], p["bb4"] = nrm((ss, ss)), nrm((1, ss))
    return p


def draftnet_reference(x, p):
    """Pure-JAX f32 reference mirroring the PyTorch forward (eval mode), unfolded."""
    ss = p["setT"].shape[0]
    collection, pack = x[:, :ss], x[:, ss:]

    def bn(v, g, b, m, var):
        return g * (v - m) / jnp.sqrt(var + EPS) + b

    def lrelu(v):
        return jnp.where(v >= 0, v, NEG_SLOPE * v)

    features = collection @ p["setT"]
    y = bn(jnp.concatenate([collection, features], axis=1),
           p["g0"], p["b0"], p["m0"], p["v0"])
    y = lrelu(bn(y @ p["w1"] + p["bb1"], p["g1"], p["bt1"], p["m1"], p["v1"]))
    y = lrelu(bn(y @ p["w2"] + p["bb2"], p["g2"], p["bt2"], p["m2"], p["v2"]))
    y = lrelu(bn(y @ p["w3"] + p["bb3"], p["g3"], p["bt3"], p["m3"], p["v3"]))
    y = y @ p["w4"] + p["bb4"]
    return y * pack


if __name__ == "__main__":
    B, ss, M = 8, 32, 16   # small shapes: batch=8, set size=32, M=16 set features
    key = jax.random.PRNGKey(0)
    kx, kp = jax.random.split(key)

    params = make_params(kp, ss, M)
    folded = fold_and_pad_params(params)   # one-time host-side BN/concat folding

    # input x = [collection | pack], shape (B, 2*ss)
    x = jax.random.uniform(kx, (B, 2 * ss), dtype=jnp.float32)

    out = draftnet_forward(x, folded)
    out = jax.block_until_ready(out)

    ref = draftnet_reference(x, params)
    assert out.shape == (B, ss)
    # bf16 matmul operands with f32 accumulation: loosened tolerance vs f32 reference.
    assert float(jnp.max(jnp.abs(out - ref))) < 5e-2, "mismatch vs reference"

    print("KERNEL_OK")
</pallas_src>

<mosaic_0001>
module attributes {stable_mosaic.version = 11 : i64} {
  func.func @draftnet_kernel(%arg0: i32, %arg1: memref<8x128xf32, #tpu.memory_space<vmem>>, %arg2: memref<4x128x128xbf16, #tpu.memory_space<vmem>>, %arg3: memref<4x1x128xf32, #tpu.memory_space<vmem>>, %arg4: memref<8x128xf32, #tpu.memory_space<vmem>>) attributes {dimension_semantics = [#tpu.dimension_semantics<parallel>], iteration_bounds = array<i64: 1>, scalar_prefetch = 0 : i64, scratch_operands = 0 : i64, tpu.core_type = #tpu.core_type<tc>, window_params = [{transform_indices = @transform_0, window_bounds = array<i64: 8, 128>}, {pipeline_mode = #tpu.pipeline_mode<synchronous>, transform_indices = @transform_1, window_bounds = array<i64: 4, 128, 128>}, {pipeline_mode = #tpu.pipeline_mode<synchronous>, transform_indices = @transform_2, window_bounds = array<i64: 4, 1, 128>}, {transform_indices = @transform_3, window_bounds = array<i64: 8, 128>}]} {
    %c0 = arith.constant 0 : index
    %c0_0 = arith.constant 0 : index
    %0 = vector.load %arg1[%c0, %c0_0] : memref<8x128xf32, #tpu.memory_space<vmem>>, vector<8x128xf32>
    %1 = arith.truncf %0 : vector<8x128xf32> to vector<8x128xbf16>
    %c0_1 = arith.constant 0 : index
    %c0_2 = arith.constant 0 : index
    %c0_3 = arith.constant 0 : index
    %2 = vector.load %arg2[%c0_1, %c0_2, %c0_3] : memref<4x128x128xbf16, #tpu.memory_space<vmem>>, vector<1x128x128xbf16>
    %3 = vector.shape_cast %2 : vector<1x128x128xbf16> to vector<128x128xbf16>
    %cst = arith.constant dense<0.000000e+00> : vector<8x128xf32>
    %4 = tpu.matmul %1, %3, %cst {dimension_numbers = #tpu.dot_dimension_numbers<[1], [0], [0], [1], [0, 0, 1, 1], [], []>} : vector<8x128xbf16>, vector<128x128xbf16>, vector<8x128xf32> -> vector<8x128xf32>
    %c0_4 = arith.constant 0 : index
    %c0_5 = arith.constant 0 : index
    %c0_6 = arith.constant 0 : index
    %5 = vector.load %arg3[%c0_4, %c0_5, %c0_6] : memref<4x1x128xf32, #tpu.memory_space<vmem>>, vector<1x1x128xf32>
    %6 = vector.shape_cast %5 : vector<1x1x128xf32> to vector<1x128xf32>
    %7 = vector.broadcast %6 : vector<1x128xf32> to vector<8x128xf32>
    %8 = arith.addf %4, %7 : vector<8x128xf32>
    %cst_7 = arith.constant 0.00999999977 : f32
    %9 = vector.broadcast %cst_7 : f32 to vector<8x128xf32>
    %10 = arith.mulf %9, %8 : vector<8x128xf32>
    %11 = arith.maximumf %8, %10 : vector<8x128xf32>
    %12 = arith.truncf %11 : vector<8x128xf32> to vector<8x128xbf16>
    %c1 = arith.constant 1 : index
    %c0_8 = arith.constant 0 : index
    %c0_9 = arith.constant 0 : index
    %13 = vector.load %arg2[%c1, %c0_8, %c0_9] : memref<4x128x128xbf16, #tpu.memory_space<vmem>>, vector<1x128x128xbf16>
    %14 = vector.shape_cast %13 : vector<1x128x128xbf16> to vector<128x128xbf16>
    %cst_10 = arith.constant dense<0.000000e+00> : vector<8x128xf32>
    %15 = tpu.matmul %12, %14, %cst_10 {dimension_numbers = #tpu.dot_dimension_numbers<[1], [0], [0], [1], [0, 0, 1, 1], [], []>} : vector<8x128xbf16>, vector<128x128xbf16>, vector<8x128xf32> -> vector<8x128xf32>
    %c1_11 = arith.constant 1 : index
    %c0_12 = arith.constant 0 : index
    %c0_13 = arith.constant 0 : index
    %16 = vector.load %arg3[%c1_11, %c0_12, %c0_13] : memref<4x1x128xf32, #tpu.memory_space<vmem>>, vector<1x1x128xf32>
    %17 = vector.shape_cast %16 : vector<1x1x128xf32> to vector<1x128xf32>
    %18 = vector.broadcast %17 : vector<1x128xf32> to vector<8x128xf32>
    %19 = arith.addf %15, %18 : vector<8x128xf32>
    %cst_14 = arith.constant 0.00999999977 : f32
    %20 = vector.broadcast %cst_14 : f32 to vector<8x128xf32>
    %21 = arith.mulf %20, %19 : vector<8x128xf32>
    %22 = arith.maximumf %19, %21 : vector<8x128xf32>
    %23 = arith.truncf %22 : vector<8x128xf32> to vector<8x128xbf16>
    %c2 = arith.constant 2 : index
    %c0_15 = arith.constant 0 : index
    %c0_16 = arith.constant 0 : index
    %24 = vector.load %arg2[%c2, %c0_15, %c0_16] : memref<4x128x128xbf16, #tpu.memory_space<vmem>>, vector<1x128x128xbf16>
    %25 = vector.shape_cast %24 : vector<1x128x128xbf16> to vector<128x128xbf16>
    %cst_17 = arith.constant dense<0.000000e+00> : vector<8x128xf32>
    %26 = tpu.matmul %23, %25, %cst_17 {dimension_numbers = #tpu.dot_dimension_numbers<[1], [0], [0], [1], [0, 0, 1, 1], [], []>} : vector<8x128xbf16>, vector<128x128xbf16>, vector<8x128xf32> -> vector<8x128xf32>
    %c2_18 = arith.constant 2 : index
    %c0_19 = arith.constant 0 : index
    %c0_20 = arith.constant 0 : index
    %27 = vector.load %arg3[%c2_18, %c0_19, %c0_20] : memref<4x1x128xf32, #tpu.memory_space<vmem>>, vector<1x1x128xf32>
    %28 = vector.shape_cast %27 : vector<1x1x128xf32> to vector<1x128xf32>
    %29 = vector.broadcast %28 : vector<1x128xf32> to vector<8x128xf32>
    %30 = arith.addf %26, %29 : vector<8x128xf32>
    %cst_21 = arith.constant 0.00999999977 : f32
    %31 = vector.broadcast %cst_21 : f32 to vector<8x128xf32>
    %32 = arith.mulf %31, %30 : vector<8x128xf32>
    %33 = arith.maximumf %30, %32 : vector<8x128xf32>
    %34 = arith.truncf %33 : vector<8x128xf32> to vector<8x128xbf16>
    %c3 = arith.constant 3 : index
    %c0_22 = arith.constant 0 : index
    %c0_23 = arith.constant 0 : index
    %35 = vector.load %arg2[%c3, %c0_22, %c0_23] : memref<4x128x128xbf16, #tpu.memory_space<vmem>>, vector<1x128x128xbf16>
    %36 = vector.shape_cast %35 : vector<1x128x128xbf16> to vector<128x128xbf16>
    %cst_24 = arith.constant dense<0.000000e+00> : vector<8x128xf32>
    %37 = tpu.matmul %34, %36, %cst_24 {dimension_numbers = #tpu.dot_dimension_numbers<[1], [0], [0], [1], [0, 0, 1, 1], [], []>} : vector<8x128xbf16>, vector<128x128xbf16>, vector<8x128xf32> -> vector<8x128xf32>
    %c3_25 = arith.constant 3 : index
    %c0_26 = arith.constant 0 : index
    %c0_27 = arith.constant 0 : index
    %38 = vector.load %arg3[%c3_25, %c0_26, %c0_27] : memref<4x1x128xf32, #tpu.memory_space<vmem>>, vector<1x1x128xf32>
    %39 = vector.shape_cast %38 : vector<1x1x128xf32> to vector<1x128xf32>
    %40 = vector.broadcast %39 : vector<1x128xf32> to vector<8x128xf32>
    %41 = arith.addf %37, %40 : vector<8x128xf32>
    %42 = arith.mulf %41, %0 : vector<8x128xf32>
    %c0_28 = arith.constant 0 : index
    %c0_29 = arith.constant 0 : index
    %43 = vector.load %arg4[%c0_28, %c0_29] : memref<8x128xf32, #tpu.memory_space<vmem>>, vector<8x128xf32>
    tpu.vector_store %arg4[%c0_28, %c0_29], %42 {strides = array<i32>} : memref<8x128xf32, #tpu.memory_space<vmem>>, vector<8x128xf32>,
    return
  }
  func.func @transform_0(%arg0: i32) -> (i32, i32) {
    %c0_i32 = arith.constant 0 : i32
    %c0_i32_0 = arith.constant 0 : i32
    return %arg0, %c0_i32 : i32, i32
  }
  func.func @transform_1(%arg0: i32) -> (i32, i32, i32) {
    %c0_i32 = arith.constant 0 : i32
    %c0_i32_0 = arith.constant 0 : i32
    %c0_i32_1 = arith.constant 0 : i32
    %c0_i32_2 = arith.constant 0 : i32
    return %c0_i32, %c0_i32_0, %c0_i32_1 : i32, i32, i32
  }
  func.func @transform_2(%arg0: i32) -> (i32, i32, i32) {
    %c0_i32 = arith.constant 0 : i32
    %c0_i32_0 = arith.constant 0 : i32
    %c0_i32_1 = arith.constant 0 : i32
    %c0_i32_2 = arith.constant 0 : i32
    return %c0_i32, %c0_i32_0, %c0_i32_1 : i32, i32, i32
  }
  func.func @transform_3(%arg0: i32) -> (i32, i32) {
    %c0_i32 = arith.constant 0 : i32
    %c0_i32_0 = arith.constant 0 : i32
    return %arg0, %c0_i32 : i32, i32
  }
}

</mosaic_0001>

<bundles_post_ra>
// kernel: tpu_custom_call.1
= control target key start
LH: loop header
LB: loop body
LE: loop exit
PB: predicated region body
PF: predicated region fallthrough
CT: control target
= control target key end

     0   :  { %8 = vsyncpa [#allocation3], 0  ;;  %s740_s0 = inlined_call_operand.hbm [shape: f32[8,128], index: 0, kind: input, shape index: {}]   ;;  %s741_s1 = inlined_call_operand.hbm [shape: bf16[4,128,128], index: 1, kind: input, shape index: {}]   ;;  %s742_s2 = inlined_call_operand.hbm [shape: f32[4,1,128], index: 2, kind: input, shape index: {}]   ;;  %s743_s3 = inlined_call_operand.hbm [shape: f32[8,128], index: 3, kind: output, shape index: {}]  }
   0x1   :  { %9 = vsyncpa [#allocation6], 0  ;;  %s26_s14 = sshll.u32 %s741_s1, 4  ;;  %s27_s14 = int_to_ptr.hbm [resolvable:$true] %s26_s14 }
   0x2   :  { %10 = vsyncpa [#allocation4], 0  ;;  %s695_s15 = smov [#allocation5]   ;;  %s16_s19 = sshll.u32 %s740_s0, 4  ;;  %s17_s19 = int_to_ptr.hbm [resolvable:$true] %s16_s19 }
   0x3   :  { %s28_s16 = sshll.u32 %s695_s15, 4  ;;  %s696_s20 = smov 64   ;;  %s29_s16 = int_to_ptr.vmem [resolvable:$true] %s28_s16 }
   0x4   :  { %s697_s21 = smov 4   ;;  %s698_s22 = smov [#allocation2]  }
   0x5   :  { %34 = dma.hbm_to_vmem [thread:$0]  %s27_s14, 4096, %s29_s16, [#allocation6], %s696_s20, %s696_s20, %s697_s21  }
   0x6   :  { %s18_s23 = sshll.u32 %s698_s22, 4  ;;  %s39_s26 = sshll.u32 %s742_s2, 4  ;;  %s19_s23 = int_to_ptr.vmem [resolvable:$true] %s18_s23  ;;  %s40_s26 = int_to_ptr.hbm [resolvable:$true] %s39_s26 }
   0x7   :  { %21 = dma.hbm_to_vmem [thread:$0]  %s17_s19, 128, %s19_s23, [#allocation3]  }
   0x8   :  { %s699_s1 = smov [#allocation7]   ;;  %s700_s28 = smov 16  }
   0x9   :  { %s41_s27 = sshll.u32 %s699_s1, 4  ;;  %s701_s29 = smov 1   ;;  %s42_s27 = int_to_ptr.vmem [resolvable:$true] %s41_s27 }
   0xa   :  { %47 = dma.hbm_to_vmem [thread:$0]  %s40_s26, 64, %s42_s27, [#allocation6], %s700_s28, %s700_s28, %s701_s29  }
   0xb   :  { %689 = dma.done.wait [#allocation3], 128  }
   0xc   :  { %690 = vsyncadd [#allocation3], 4294967168 }
   0xd   :  { %691 = dma.done.wait [#allocation6], 4160  }
   0xe   :  { %692 = vsyncadd [#allocation6], 4294963136  ;;  %v556_v0 = vld [vmem:[#allocation5 + $0x38] sm:$0xff]  ;;  %v555_v1 = vld [vmem:[#allocation5 + $0x30] sm:$0xff]  ;;  %s702_s0 = smov [#allocation8]   ;;  %s410_s5 = sshll.u32 %s743_s3, 4  ;;  %s411_s5 = int_to_ptr.hbm [resolvable:$true] %s410_s5 }
   0xf   :  { %130 = vmatpush.bf16.msra.mxu0 %v556_v0  ;;  %v564_v2 = vld [vmem:[#allocation5 + $0x78] sm:$0xff]  ;;  %v563_v3 = vld [vmem:[#allocation5 + $0x70] sm:$0xff]  ;;  %v554_v4 = vld [vmem:[#allocation5 + $0x28] sm:$0xff]  ;;  %s408_s2 = sshll.u32 %s702_s0, 4  ;;  %s409_s2 = int_to_ptr.vmem [resolvable:$true] %s408_s2 }
  0x10   :  { %216 = vmatpush.bf16.msra.mxu1 %v564_v2  ;;  %v562_v5 = vld [vmem:[#allocation5 + $0x68] sm:$0xff]  ;;  %v553_v6 = vld [vmem:[#allocation5 + $0x20] sm:$0xff]  ;;  %v552_v8 = vld [vmem:[#allocation5 + $0x18] sm:$0xff] }
  0x11   :  { %v561_v7 = vld [vmem:[#allocation5 + $0x60] sm:$0xff]  ;;  %v560_v9 = vld [vmem:[#allocation5 + $0x58] sm:$0xff]  ;;  %v551_v10 = vld [vmem:[#allocation5 + $0x10] sm:$0xff] }
  0x12   :  { %v559_v11 = vld [vmem:[#allocation5 + $0x50] sm:$0xff]  ;;  %v550_v12 = vld [vmem:[#allocation5 + $0x8] sm:$0xff]  ;;  %v549_v13 = vld [vmem:[#allocation5] sm:$0xff] }
  0x13   :  { %131 = vmatpush.bf16.msra.mxu0 %v555_v1  ;;  %v732_v14 = vld [vmem:[#allocation2] sm:$0xff]  ;;  %v558_v16 = vld [vmem:[#allocation5 + $0x48] sm:$0xff]  ;;  %v557_v17 = vld [vmem:[#allocation5 + $0x40] sm:$0xff] }
  0x14   :  { %217 = vmatpush.bf16.msra.mxu1 %v563_v3  ;;  %v61_v15 = vpack.c.bf16 %v732_v14, %v732_v14  ;;  %v572_v18 = vld [vmem:[#allocation5 + $0xb8] sm:$0xff]  ;;  %v571_v19 = vld [vmem:[#allocation5 + $0xb0] sm:$0xff]  ;;  %v570_v20 = vld [vmem:[#allocation5 + $0xa8] sm:$0xff] }
  0x15   :  { %302 = vmatpush.bf16.msra.mxu2 %v572_v18  ;;  %v569_v21 = vld [vmem:[#allocation5 + $0xa0] sm:$0xff]  ;;  %v568_v22 = vld [vmem:[#allocation5 + $0x98] sm:$0xff]  ;;  %v567_v23 = vld [vmem:[#allocation5 + $0x90] sm:$0xff] }
  0x16   :  { %v589_v24 = vld [vmem:[#allocation7] ss:$0 sm:$0xff]  ;;  %v566_v31 = vld [vmem:[#allocation5 + $0x88] sm:$0xff]  ;;  %v580_v33 = vld [vmem:[#allocation5 + $0xf8] sm:$0xff] }
  0x17   :  { %132 = vmatpush.bf16.msra.mxu0 %v554_v4  ;;  %v565_v32 = vld [vmem:[#allocation5 + $0x80] sm:$0xff]  ;;  %388 = vmatpush.bf16.msra.mxu3 %v580_v33  ;;  %v579_v34 = vld [vmem:[#allocation5 + $0xf0] sm:$0xff]  ;;  %v578_v35 = vld [vmem:[#allocation5 + $0xe8] sm:$0xff] }
  0x18   :  { %218 = vmatpush.bf16.msra.mxu1 %v562_v5  ;;  %v577_v36 = vld [vmem:[#allocation5 + $0xe0] sm:$0xff]  ;;  %v576_v37 = vld [vmem:[#allocation5 + $0xd8] sm:$0xff]  ;;  %v575_v38 = vld [vmem:[#allocation5 + $0xd0] sm:$0xff] }
  0x19   :  { %303 = vmatpush.bf16.msra.mxu2 %v571_v19  ;;  %v590_v39 = vld [vmem:[#allocation7 + $0x1] ss:$0 sm:$0xff]  ;;  %v574_v46 = vld [vmem:[#allocation5 + $0xc8] sm:$0xff]  ;;  %v591_v48 = vld [vmem:[#allocation7 + $0x2] ss:$0 sm:$0xff] }
  0x1a   :  { %v573_v47 = vld [vmem:[#allocation5 + $0xc0] sm:$0xff] }
  0x1b   :  { %133 = vmatpush.bf16.msra.mxu0 %v553_v6  ;;  %389 = vmatpush.bf16.msra.mxu3 %v579_v34  ;;  %v592_v55 = vld [vmem:[#allocation7 + $0x3] ss:$0 sm:$0xff] }
  0x1c   :  { %219 = vmatpush.bf16.msra.mxu1 %v561_v7 }
  0x1d   :  { %304 = vmatpush.bf16.msra.mxu2 %v570_v20 }
  0x1f   :  { %134 = vmatpush.bf16.msra.mxu0 %v552_v8  ;;  %390 = vmatpush.bf16.msra.mxu3 %v578_v35 }
  0x20   :  { %220 = vmatpush.bf16.msra.mxu1 %v560_v9 }
  0x21   :  { %305 = vmatpush.bf16.msra.mxu2 %v569_v21 }
  0x23   :  { %135 = vmatpush.bf16.msra.mxu0 %v551_v10  ;;  %391 = vmatpush.bf16.msra.mxu3 %v577_v36 }
  0x24   :  { %221 = vmatpush.bf16.msra.mxu1 %v559_v11 }
  0x25   :  { %306 = vmatpush.bf16.msra.mxu2 %v568_v22 }
  0x27   :  { %136 = vmatpush.bf16.msra.mxu0 %v550_v12  ;;  %392 = vmatpush.bf16.msra.mxu3 %v576_v37 }
  0x28   :  { %222 = vmatpush.bf16.msra.mxu1 %v558_v16 }
  0x29   :  { %307 = vmatpush.bf16.msra.mxu2 %v567_v23 }
  0x2b   :  { %137 = vmatpush.bf16.msra.mxu0 %v549_v13  ;;  %393 = vmatpush.bf16.msra.mxu3 %v575_v38 }
  0x2c   :  { %223 = vmatpush.bf16.msra.mxu1 %v557_v17 }
  0x2d   :  { %308 = vmatpush.bf16.msra.mxu2 %v566_v31 }
  0x2e   :  { %138 = vmatmul.bf16.vlgmr.msra.gmra.mxu0 %v61_v15 }
  0x2f   :  { %394 = vmatpush.bf16.msra.mxu3 %v574_v46 }
  0x31   :  { %309 = vmatpush.bf16.msra.mxu2 %v565_v32 }
  0x33   :  { %395 = vmatpush.bf16.msra.mxu3 %v573_v47 }
  0xab   :  { %v139_v25 = vpop.f32.mrf.mxu0 }
  0xac   :  { %v140_v26 = vadd.f32 %v589_v24, %v139_v25 }
  0xae   :  { %v143_v27 = vmul.f32 0.01, %v140_v26 }
  0xb0   :  { %v144_v28 = vmax.f32 %v140_v26, %v143_v27 }
  0xb2   :  { %v145_v29 = vpack.c.bf16 %v144_v28, %v144_v28 }
  0xb3   :  { %v141_v30 = vpop.f32.mrf.mxu0 }
  0xb4   :  { %224 = vmatmul.bf16.vlgmr.msra.gmra.mxu1 %v145_v29 }
 0x131   :  { %v225_v40 = vpop.f32.mrf.mxu1 }
 0x132   :  { %v226_v41 = vadd.f32 %v590_v39, %v225_v40 }
 0x134   :  { %v229_v42 = vmul.f32 0.01, %v226_v41 }
 0x136   :  { %v230_v43 = vmax.f32 %v226_v41, %v229_v42 }
 0x138   :  { %v231_v44 = vpack.c.bf16 %v230_v43, %v230_v43 }
 0x139   :  { %v227_v45 = vpop.f32.mrf.mxu1 }
 0x13a   :  { %310 = vmatmul.bf16.vlgmr.msra.gmra.mxu2 %v231_v44 }
 0x1bd   :  { %v311_v49 = vpop.f32.mrf.mxu2 }
 0x1be   :  { %v312_v50 = vadd.f32 %v591_v48, %v311_v49 }
 0x1c0   :  { %v315_v51 = vmul.f32 0.01, %v312_v50 }
 0x1c2   :  { %v316_v52 = vmax.f32 %v312_v50, %v315_v51 }
 0x1c4   :  { %v317_v53 = vpack.c.bf16 %v316_v52, %v316_v52 }
 0x1c5   :  { %v313_v54 = vpop.f32.mrf.mxu2 }
 0x1c6   :  { %396 = vmatmul.bf16.vlgmr.msra.gmra.mxu3 %v317_v53 }
 0x249   :  { %v397_v56 = vpop.f32.mrf.mxu3 }
 0x24a   :  { %v398_v57 = vadd.f32 %v592_v55, %v397_v56 }
 0x24c   :  { %v401_v58 = vmul.f32 %v398_v57, %v732_v14 }
 0x24e   :  { %402 = vst [vmem:[#allocation8] sm:$0xff] %v401_v58 }
 0x24f   :  { %413 = dma.vmem_to_hbm [thread:$0]  %s409_s2, 128, %s411_s5, [#allocation4]  }
 0x251   :  { %v399_v59 = vpop.f32.mrf.mxu3 }
 0x252   :  { %693 = dma.done.wait [#allocation4], 128  }
 0x253   :  { %694 = vsyncadd [#allocation4], 4294967168 }
 0x254   :  { %418 = vsyncpa [#allocation3], 1 }
 0x255   :  { %419 = vsyncpa [#allocation6], 1 }
 0x256   :  { %420 = vsyncpa [#allocation4], 1 }

</bundles_post_ra>
